<compile_context>
chip_gen: v7x
topology: tpu7x:2x2x1
jax: 0.10.0
libtpu: 0.0.40
codegen_flags: <defaults>
</compile_context>

<pallas_src>
import functools

import jax
import jax.numpy as jnp
from jax.experimental import pallas as pl
from jax.experimental.pallas import tpu as pltpu

NEG_INF = -1e30
NEG_SLOPE = 0.2          # PyG GATConv default negative_slope
LANE = 128
VMEM_LIMIT_PROJ = 32 * 1024 * 1024
VMEM_LIMIT_AGG = 48 * 1024 * 1024      # tiles sized well under v7x's 64 MiB
H_RESIDENT_BYTES = 12 * 1024 * 1024    # keep h fully VMEM-resident below this


def _round_up(v, m):
    return ((v + m - 1) // m) * m


def _pad2(a, rows, cols):
    return jnp.pad(a, ((0, rows - a.shape[0]), (0, cols - a.shape[1])))


# --------------------------------------------------------------------------
# Projection pass (per layer): h = x @ W ; [alpha_src, alpha_dst] = h @ [a_s|a_d]
# --------------------------------------------------------------------------
def _project_kernel(x_ref, w_ref, a_ref, h_ref, alpha_ref):
    h = jnp.dot(x_ref[...], w_ref[...], preferred_element_type=jnp.float32)
    h_ref[...] = h.astype(h_ref.dtype)                       # bf16 for the N^2 pass
    alpha_ref[...] = jnp.dot(h, a_ref[...],                  # extra MXU columns
                             preferred_element_type=jnp.float32)


def _project(x, w_t, a_mat, *, tile_r):
    n, fin = x.shape
    c = w_t.shape[1]
    return pl.pallas_call(
        _project_kernel,
        out_shape=(jax.ShapeDtypeStruct((n, c), jnp.bfloat16),
                   jax.ShapeDtypeStruct((n, 2), jnp.float32)),
        grid_spec=pltpu.PrefetchScalarGridSpec(
            num_scalar_prefetch=0,
            grid=(n // tile_r,),
            in_specs=[pl.BlockSpec((tile_r, fin), lambda r: (r, 0)),
                      pl.BlockSpec((fin, c), lambda r: (0, 0)),
                      pl.BlockSpec((c, 2), lambda r: (0, 0))],
            out_specs=[pl.BlockSpec((tile_r, c), lambda r: (r, 0)),
                       pl.BlockSpec((tile_r, 2), lambda r: (r, 0))]),
        compiler_params=pltpu.CompilerParams(
            dimension_semantics=("parallel",),
            vmem_limit_bytes=VMEM_LIMIT_PROJ),
    )(x, w_t, a_mat)


# --------------------------------------------------------------------------
# Aggregation pass (per layer, O(N^2)): masked softmax (rank-1 shift) + p @ h
# --------------------------------------------------------------------------
def _aggregate_kernel(adj_ref, h_ref, asrc_ref, adst_ref, m_ref, b_ref,
                      o_ref, l_sc, *, mode, valid_cols, h_resident, tile_k):
    k = pl.program_id(1)

    @pl.when(k == 0)
    def _():
        l_sc[...] = jnp.zeros_like(l_sc)
        o_ref[...] = jnp.zeros_like(o_ref)

    if h_resident:
        start = pl.multiple_of(k * tile_k, tile_k)
        h = h_ref[pl.ds(start, tile_k), :]          # VMEM-resident h, fetched once
    else:
        h = h_ref[...]                              # streamed (tile_k, c) block

    # e[i,j] = leaky_relu(alpha_dst[i] + alpha_src[j]); m_ref is a precomputed
    # per-row upper bound (leaky_relu is monotone), so exp never overflows and
    # no online-softmax max/rescale bookkeeping is needed.
    e = adst_ref[...] + asrc_ref[...]               # (tm,1)+(1,tk) broadcast
    e = jnp.maximum(e, NEG_SLOPE * e)               # leaky_relu
    p = jnp.exp(e - m_ref[...])                     # in (0, 1]
    p = p * adj_ref[...].astype(jnp.float32)        # 0/1 mask: exact zeros off-edges
    l_sc[...] += jnp.sum(p, axis=-1, keepdims=True)
    o_ref[...] += jnp.dot(p.astype(jnp.bfloat16), h,      # bf16 MXU, f32 accum
                          preferred_element_type=jnp.float32)

    @pl.when(k == pl.num_programs(1) - 1)
    def _():
        z = o_ref[...] / l_sc[...] + b_ref[...]     # exact divide, once per row tile
        if mode == "relu":
            o_ref[...] = jnp.maximum(z, 0.0)
        else:  # log_softmax over the (unpadded) feature axis
            cols = jax.lax.broadcasted_iota(jnp.int32, z.shape, 1)
            zz = jnp.where(cols < valid_cols, z, NEG_INF)
            mx = jnp.max(zz, axis=-1, keepdims=True)
            lse = jnp.log(jnp.sum(jnp.exp(zz - mx), axis=-1, keepdims=True))
            o_ref[...] = zz - mx - lse


def _aggregate(adj, h, asrc_row, adst_col, m_col, bias, *,
               tile_m, tile_k, mode, valid_cols):
    npad = adj.shape[0]
    c = h.shape[1]
    # Keep h fully VMEM-resident (fetched once) when it fits; stream otherwise.
    h_resident = (npad > tile_k) and (npad * c * 2 * 2 <= H_RESIDENT_BYTES)
    if h_resident:
        h_spec = pl.BlockSpec((npad, c), lambda i, k: (0, 0))
    else:
        h_spec = pl.BlockSpec((tile_k, c), lambda i, k: (k, 0))
    kernel = functools.partial(_aggregate_kernel, mode=mode,
                               valid_cols=valid_cols,
                               h_resident=h_resident, tile_k=tile_k)
    return pl.pallas_call(
        kernel,
        out_shape=jax.ShapeDtypeStruct((npad, c), jnp.float32),
        grid_spec=pltpu.PrefetchScalarGridSpec(
            num_scalar_prefetch=0,
            grid=(npad // tile_m, npad // tile_k),
            in_specs=[pl.BlockSpec((tile_m, tile_k), lambda i, k: (i, k)),  # adj bf16
                      h_spec,                                               # h bf16
                      pl.BlockSpec((1, tile_k), lambda i, k: (0, k)),       # alpha_src
                      pl.BlockSpec((tile_m, 1), lambda i, k: (i, 0)),       # alpha_dst
                      pl.BlockSpec((tile_m, 1), lambda i, k: (i, 0)),       # row shift m
                      pl.BlockSpec((1, c), lambda i, k: (0, 0))],           # bias
            out_specs=pl.BlockSpec((tile_m, c), lambda i, k: (i, 0)),
            scratch_shapes=[pltpu.VMEM((tile_m, 1), jnp.float32)]),         # denom l
        compiler_params=pltpu.CompilerParams(
            dimension_semantics=("parallel", "arbitrary"),
            vmem_limit_bytes=VMEM_LIMIT_AGG),
    )(adj, h, asrc_row, adst_col, m_col, bias)


# --------------------------------------------------------------------------
# Tile plan + full forward
# --------------------------------------------------------------------------
def _tile_plan(n):
    npad = _round_up(n, LANE)
    if npad > 1024:
        tile_k = 1024
        npad = _round_up(npad, tile_k)
    else:
        tile_k = npad
    tile_m = tile_k
    # Keep >= 4 row tiles when possible so the "parallel" axis load-balances
    # across v7x's two TensorCores.
    while tile_m >= 2 * LANE and npad // tile_m < 4:
        tile_m //= 2
    return npad, tile_m, tile_k


def _alpha_splits(alpha, npad):
    s_col = alpha[:, 0:1]                           # alpha_src, (npad, 1)
    d_col = alpha[:, 1:2]                           # alpha_dst, (npad, 1)
    # Rank-1 row bound: max_j e[i,j] <= leaky_relu(alpha_dst[i] + max_j alpha_src[j]).
    t = d_col + jnp.max(s_col)
    m_col = jnp.maximum(t, NEG_SLOPE * t)
    return s_col.reshape(1, npad), d_col, m_col


def gat_forward(x, edge_index, params):
    n, fin = x.shape
    hid = params["w1"].shape[0]
    out = params["w2"].shape[0]

    npad, tile_m, tile_k = _tile_plan(n)
    fin_p = _round_up(fin, LANE)
    hid_p = _round_up(hid, LANE)
    out_p = _round_up(out, LANE)

    # One-time host-side padding + weight pre-transpose (no in-kernel W.T).
    x_p = _pad2(x.astype(jnp.float32), npad, fin_p)
    w1_t = _pad2(params["w1"].T.astype(jnp.float32), fin_p, hid_p)
    a1 = jnp.concatenate(
        [_pad2(params["as1"].astype(jnp.float32), 1, hid_p).T,
         _pad2(params["ad1"].astype(jnp.float32), 1, hid_p).T], axis=1)  # (hid_p, 2)
    b1 = _pad2(params["b1"].astype(jnp.float32), 1, hid_p)
    w2_t = _pad2(params["w2"].T.astype(jnp.float32), hid_p, out_p)
    a2 = jnp.concatenate(
        [_pad2(params["as2"].astype(jnp.float32), 1, out_p).T,
         _pad2(params["ad2"].astype(jnp.float32), 1, out_p).T], axis=1)  # (out_p, 2)
    b2 = _pad2(params["b2"].astype(jnp.float32), 1, out_p)

    # Dense 0/1 adjacency mask in bf16 (adj[i, j] = 1 iff edge j -> i) with
    # self-loops on every row (incl. padded rows, so no softmax row is empty).
    # Single fused scatter -- no N^2 eye/maximum read-modify-write pass.
    diag = jnp.arange(npad, dtype=jnp.int32)
    rows = jnp.concatenate([edge_index[1].astype(jnp.int32), diag])
    cols = jnp.concatenate([edge_index[0].astype(jnp.int32), diag])
    adj = jnp.zeros((npad, npad), jnp.bfloat16).at[rows, cols].set(1.0)

    # ---- layer 1: GATConv -> ReLU ----
    h1, alpha1 = _project(x_p, w1_t, a1, tile_r=tile_m)
    s1, d1, m1 = _alpha_splits(alpha1, npad)
    h1a = _aggregate(adj, h1, s1, d1, m1, b1,
                     tile_m=tile_m, tile_k=tile_k, mode="relu",
                     valid_cols=hid_p)
    # TODO(synk): F.dropout is identity at inference; training-mode RNG dropout not implemented.

    # ---- layer 2: GATConv -> log_softmax(dim=1) ----
    h2, alpha2 = _project(h1a, w2_t, a2, tile_r=tile_m)
    s2, d2, m2 = _alpha_splits(alpha2, npad)
    out_full = _aggregate(adj, h2, s2, d2, m2, b2,
                          tile_m=tile_m, tile_k=tile_k, mode="log_softmax",
                          valid_cols=out)

    # Padded rows carry relu(b1)-derived values but have no edges into real
    # rows, so rows [:n] are unaffected; padding is sliced off here.
    return out_full[:n, :out]


def init_params(key, in_feat, hid_feat, out_feat):
    ks = jax.random.split(key, 8)
    s1 = 1.0 / jnp.sqrt(in_feat)
    s2 = 1.0 / jnp.sqrt(hid_feat)
    return {
        "w1":  jax.random.normal(ks[0], (hid_feat, in_feat), jnp.float32) * s1,
        "as1": jax.random.normal(ks[1], (1, hid_feat), jnp.float32) * s2,
        "ad1": jax.random.normal(ks[2], (1, hid_feat), jnp.float32) * s2,
        "b1":  jnp.zeros((1, hid_feat), jnp.float32),
        "w2":  jax.random.normal(ks[3], (out_feat, hid_feat), jnp.float32) * s2,
        "as2": jax.random.normal(ks[4], (1, out_feat), jnp.float32) / jnp.sqrt(out_feat),
        "ad2": jax.random.normal(ks[5], (1, out_feat), jnp.float32) / jnp.sqrt(out_feat),
        "b2":  jnp.zeros((1, out_feat), jnp.float32),
    }


if __name__ == "__main__":
    N, IN_FEAT, HID_FEAT, OUT_FEAT = 8, 16, 32, 8

    key = jax.random.PRNGKey(0)
    k_x, k_p = jax.random.split(key)
    x = jax.random.normal(k_x, (N, IN_FEAT), jnp.float32)

    # Deterministic small graph: a bidirectional ring over N nodes.
    src = jnp.concatenate([jnp.arange(N), (jnp.arange(N) + 1) % N])
    dst = jnp.concatenate([(jnp.arange(N) + 1) % N, jnp.arange(N)])
    edge_index = jnp.stack([src, dst]).astype(jnp.int32)  # [2, 16]

    params = init_params(k_p, IN_FEAT, HID_FEAT, OUT_FEAT)

    out = gat_forward(x, edge_index, params)
    jax.block_until_ready(out)
    assert out.shape == (N, OUT_FEAT)
    print("KERNEL_OK")
</pallas_src>

<mosaic_0001>
module attributes {stable_mosaic.version = 11 : i64} {
  func.func @_project_kernel(%arg0: i32, %arg1: memref<128x128xf32, #tpu.memory_space<vmem>>, %arg2: memref<128x128xf32, #tpu.memory_space<vmem>>, %arg3: memref<128x2xf32, #tpu.memory_space<vmem>>, %arg4: memref<128x128xbf16, #tpu.memory_space<vmem>>, %arg5: memref<128x2xf32, #tpu.memory_space<vmem>>) attributes {dimension_semantics = [#tpu.dimension_semantics<parallel>], iteration_bounds = array<i64: 1>, scalar_prefetch = 0 : i64, scratch_operands = 0 : i64, tpu.core_type = #tpu.core_type<tc>, window_params = [{transform_indices = @transform_0, window_bounds = array<i64: 128, 128>}, {pipeline_mode = #tpu.pipeline_mode<synchronous>, transform_indices = @transform_1, window_bounds = array<i64: 128, 128>}, {pipeline_mode = #tpu.pipeline_mode<synchronous>, transform_indices = @transform_2, window_bounds = array<i64: 128, 2>}, {transform_indices = @transform_3, window_bounds = array<i64: 128, 128>}, {transform_indices = @transform_4, window_bounds = array<i64: 128, 2>}]} {
    %c0 = arith.constant 0 : index
    %c0_0 = arith.constant 0 : index
    %0 = vector.load %arg1[%c0, %c0_0] : memref<128x128xf32, #tpu.memory_space<vmem>>, vector<128x128xf32>
    %c0_1 = arith.constant 0 : index
    %c0_2 = arith.constant 0 : index
    %1 = vector.load %arg2[%c0_1, %c0_2] : memref<128x128xf32, #tpu.memory_space<vmem>>, vector<128x128xf32>
    %cst = arith.constant dense<0.000000e+00> : vector<128x128xf32>
    %2 = tpu.matmul %0, %1, %cst {dimension_numbers = #tpu.dot_dimension_numbers<[1], [0], [0], [1], [0, 0, 1, 1], [], []>} : vector<128x128xf32>, vector<128x128xf32>, vector<128x128xf32> -> vector<128x128xf32>
    %3 = arith.truncf %2 : vector<128x128xf32> to vector<128x128xbf16>
    %c0_3 = arith.constant 0 : index
    %c0_4 = arith.constant 0 : index
    %4 = vector.load %arg4[%c0_3, %c0_4] : memref<128x128xbf16, #tpu.memory_space<vmem>>, vector<128x128xbf16>
    tpu.vector_store %arg4[%c0_3, %c0_4], %3 {strides = array<i32>} : memref<128x128xbf16, #tpu.memory_space<vmem>>, vector<128x128xbf16>,
    %c0_5 = arith.constant 0 : index
    %c0_6 = arith.constant 0 : index
    %5 = vector.load %arg3[%c0_5, %c0_6] : memref<128x2xf32, #tpu.memory_space<vmem>>, vector<128x2xf32>
    %cst_7 = arith.constant dense<0.000000e+00> : vector<128x2xf32>
    %6 = tpu.matmul %2, %5, %cst_7 {dimension_numbers = #tpu.dot_dimension_numbers<[1], [0], [0], [1], [0, 0, 1, 1], [], []>} : vector<128x128xf32>, vector<128x2xf32>, vector<128x2xf32> -> vector<128x2xf32>
    %c0_8 = arith.constant 0 : index
    %c0_9 = arith.constant 0 : index
    %7 = vector.load %arg5[%c0_8, %c0_9] : memref<128x2xf32, #tpu.memory_space<vmem>>, vector<128x2xf32>
    tpu.vector_store %arg5[%c0_8, %c0_9], %6 {strides = array<i32>} : memref<128x2xf32, #tpu.memory_space<vmem>>, vector<128x2xf32>,
    return
  }
  func.func @transform_0(%arg0: i32) -> (i32, i32) {
    %c0_i32 = arith.constant 0 : i32
    %c0_i32_0 = arith.constant 0 : i32
    return %arg0, %c0_i32 : i32, i32
  }
  func.func @transform_1(%arg0: i32) -> (i32, i32) {
    %c0_i32 = arith.constant 0 : i32
    %c0_i32_0 = arith.constant 0 : i32
    %c0_i32_1 = arith.constant 0 : i32
    return %c0_i32, %c0_i32_0 : i32, i32
  }
  func.func @transform_2(%arg0: i32) -> (i32, i32) {
    %c0_i32 = arith.constant 0 : i32
    %c0_i32_0 = arith.constant 0 : i32
    %c0_i32_1 = arith.constant 0 : i32
    return %c0_i32, %c0_i32_0 : i32, i32
  }
  func.func @transform_3(%arg0: i32) -> (i32, i32) {
    %c0_i32 = arith.constant 0 : i32
    %c0_i32_0 = arith.constant 0 : i32
    return %arg0, %c0_i32 : i32, i32
  }
  func.func @transform_4(%arg0: i32) -> (i32, i32) {
    %c0_i32 = arith.constant 0 : i32
    %c0_i32_0 = arith.constant 0 : i32
    return %arg0, %c0_i32 : i32, i32
  }
}

</mosaic_0001>

<bundles_post_ra>
// kernel: tpu_custom_call.1
= control target key start
LH: loop header
LB: loop body
LE: loop exit
PB: predicated region body
PF: predicated region fallthrough
CT: control target
= control target key end

     0   :  { %10 = vsyncpa [#allocation3], 0  ;;  %s1075_s0 = inlined_call_operand.vmem [shape: f32[128,128], index: 0, kind: input, shape index: {}]   ;;  %s1076_s1 = inlined_call_operand.hbm [shape: f32[128,128], index: 1, kind: input, shape index: {}]   ;;  %s1077_s2 = inlined_call_operand.vmem [shape: f32[128,2], index: 2, kind: input, shape index: {}]   ;;  %s1078_s3 = inlined_call_operand.hbm [shape: bf16[128,128], index: 3, kind: output, shape index: {0}]   ;;  %s1079_s4 = inlined_call_operand.vmem [shape: f32[128,2], index: 4, kind: output, shape index: {1}]  }
   0x1   :  { %11 = vsyncpa [#allocation4], 0  ;;  %s860_s15 = smov [#allocation2]   ;;  %s812_s19 = scalar_lea.hbm %s1076_s1, 2048 }
   0x2   :  { %s19_s16 = sshll.u32 %s860_s15, 4  ;;  %p813_p0 = scmp.ne.s32.totalorder %s1076_s1, %s812_s19  ;;  %s20_s16 = int_to_ptr.vmem [resolvable:$true] %s19_s16 }
   0x3   :  { %p816_p1 = scmp.lt.u32.totalorder %s812_s19, %s1076_s1 }
   0x5   :  { %p818_p2 = pnand %p816_p1, %p813_p0 }
   0x7   :  { %821 = shalt.err (!%p818_p2)
}
   0x8   :  { %s822_s24 = scalar_lea.vmem %s20_s16, 2048  ;;  %p827_p4 = scmp.lt.s32.totalorder %s20_s16, %s20_s16 }
   0x9   :  { %p823_p3 = scmp.ne.s32.totalorder %s20_s16, %s822_s24  ;;  %p828_p5 = scmp.lt.s32.totalorder %s822_s24, %s822_s24 }
   0xb   :  { %p829_p6 = por %p828_p5, %p827_p4 }
   0xd   :  { %p830_p7 = pnand %p829_p6, %p823_p3 }
   0xf   :  { %833 = shalt.err (!%p830_p7)
}
  0x10   :  { %s861_s25 = smov 128   ;;  %s862_s26 = smov 8  }
  0x11   :  { %25 = dma.hbm_to_vmem [thread:$0]  %s1076_s1, 2048, %s20_s16, [#allocation3], %s861_s25, %s861_s25, %s862_s26  }
  0x12   :  { %856 = dma.done.wait [#allocation3], 2048  }
  0x13   :  { %857 = vsyncadd [#allocation3], 4294965248  ;;  %v47_v0 = vld [vmem:[#allocation2] sm:$0xff]  ;;  %v48_v1 = vld [vmem:[#allocation2 + $0x8] sm:$0xff] }
  0x14   :  { %v49_v2 = vld [vmem:[#allocation2 + $0x10] sm:$0xff]  ;;  %v742_v3 = vpack.c.bf16 %v48_v1, %v47_v0  ;;  %v50_v4 = vld [vmem:[#allocation2 + $0x18] sm:$0xff]  ;;  %v51_v6 = vld [vmem:[#allocation2 + $0x20] sm:$0xff] }
  0x15   :  { %v746_v5 = vpack.c.bf16 %v50_v4, %v49_v2  ;;  %v52_v7 = vld [vmem:[#allocation2 + $0x28] sm:$0xff]  ;;  %v31_v9 = vld [vmem:[%s1075_s0] sm:$0xff]  ;;  %v53_v10 = vld [vmem:[#allocation2 + $0x30] sm:$0xff] }
  0x16   :  { %743 = vmatprep.subr.bf16.mxu0 %v742_v3  ;;  %v750_v8 = vpack.c.bf16 %v52_v7, %v51_v6  ;;  %v54_v11 = vld [vmem:[#allocation2 + $0x38] sm:$0xff]  ;;  %662 = vmatprep.mubr.f32.mxu0 %v31_v9  ;;  %v55_v13 = vld [vmem:[#allocation2 + $0x40] sm:$0xff]  ;;  %v56_v14 = vld [vmem:[#allocation2 + $0x48] sm:$0xff] }
  0x17   :  { %745 = vmatpush3.bf16.msra.mxu0 %v742_v3  ;;  %v754_v12 = vpack.c.bf16 %v54_v11, %v53_v10  ;;  %v288_v15 = vld [vmem:[%s1077_s2] sm:$0xff]  ;;  %v289_v16 = vld [vmem:[%s1077_s2 + $0x8] sm:$0xff]  ;;  %v290_v17 = vld [vmem:[%s1077_s2 + $0x10] sm:$0xff]  ;;  %v758_v21 = vpack.c.bf16 %v56_v14, %v55_v13 }
  0x18   :  { %747 = vmatprep.subr.bf16.mxu0 %v746_v5  ;;  %v291_v18 = vld [vmem:[%s1077_s2 + $0x18] sm:$0xff]  ;;  %v774_v19 = vpack.c.bf16 %v289_v16, %v288_v15  ;;  %v292_v22 = vld [vmem:[%s1077_s2 + $0x20] sm:$0xff]  ;;  %v293_v23 = vld [vmem:[%s1077_s2 + $0x28] sm:$0xff] }
  0x19   :  { %v778_v20 = vpack.c.bf16 %v291_v18, %v290_v17  ;;  %v57_v24 = vld [vmem:[#allocation2 + $0x50] sm:$0xff]  ;;  %v58_v25 = vld [vmem:[#allocation2 + $0x58] sm:$0xff]  ;;  %v782_v26 = vpack.c.bf16 %v293_v23, %v292_v22  ;;  %v59_v30 = vld [vmem:[#allocation2 + $0x60] sm:$0xff] }
  0x1a   :  { %775 = vmatprep.subr.bf16.mxu1 %v774_v19  ;;  %v762_v27 = vpack.c.bf16 %v58_v25, %v57_v24  ;;  %v294_v28 = vld [vmem:[%s1077_s2 + $0x30] sm:$0xff]  ;;  %v295_v29 = vld [vmem:[%s1077_s2 + $0x38] sm:$0xff]  ;;  %v60_v31 = vld [vmem:[#allocation2 + $0x68] sm:$0xff] }
  0x1b   :  { %749 = vmatpush3.bf16.msra.mxu0 %v746_v5  ;;  %777 = vmatpush3.bf16.msra.mxu1 %v774_v19  ;;  %v786_v32 = vpack.c.bf16 %v295_v29, %v294_v28  ;;  %v766_v33 = vpack.c.bf16 %v60_v31, %v59_v30  ;;  %v296_v34 = vld [vmem:[%s1077_s2 + $0x40] sm:$0xff]  ;;  %v297_v35 = vld [vmem:[%s1077_s2 + $0x48] sm:$0xff]  ;;  %v61_v36 = vld [vmem:[#allocation2 + $0x70] sm:$0xff] }
  0x1c   :  { %751 = vmatprep.subr.bf16.mxu0 %v750_v8  ;;  %779 = vmatprep.subr.bf16.mxu1 %v778_v20  ;;  %v62_v37 = vld [vmem:[#allocation2 + $0x78] sm:$0xff]  ;;  %v790_v38 = vpack.c.bf16 %v297_v35, %v296_v34  ;;  %v298_v40 = vld [vmem:[%s1077_s2 + $0x50] sm:$0xff]  ;;  %v300_v43 = vld [vmem:[%s1077_s2 + $0x60] sm:$0xff] }
  0x1d   :  { %v770_v39 = vpack.c.bf16 %v62_v37, %v61_v36  ;;  %v299_v41 = vld [vmem:[%s1077_s2 + $0x58] sm:$0xff]  ;;  %v301_v44 = vld [vmem:[%s1077_s2 + $0x68] sm:$0xff]  ;;  %v33_v47 = vld [vmem:[%s1075_s0 + $0x10] sm:$0xff] }
  0x1e   :  { %v794_v42 = vpack.c.bf16 %v299_v41, %v298_v40  ;;  %v32_v45 = vld [vmem:[%s1075_s0 + $0x8] sm:$0xff]  ;;  %v798_v46 = vpack.c.bf16 %v301_v44, %v300_v43  ;;  %v302_v48 = vld [vmem:[%s1077_s2 + $0x70] sm:$0xff]  ;;  %v303_v49 = vld [vmem:[%s1077_s2 + $0x78] sm:$0xff] }
  0x1f   :  { %753 = vmatpush3.bf16.msra.mxu0 %v750_v8  ;;  %781 = vmatpush3.bf16.msra.mxu1 %v778_v20  ;;  %v34_v50 = vld [vmem:[%s1075_s0 + $0x18] sm:$0xff]  ;;  %v802_v51 = vpack.c.bf16 %v303_v49, %v302_v48  ;;  %v35_v52 = vld [vmem:[%s1075_s0 + $0x20] sm:$0xff]  ;;  %v36_v53 = vld [vmem:[%s1075_s0 + $0x28] sm:$0xff] }
  0x20   :  { %755 = vmatprep.subr.bf16.mxu0 %v754_v12  ;;  %783 = vmatprep.subr.bf16.mxu1 %v782_v26  ;;  %v37_v54 = vld [vmem:[%s1075_s0 + $0x30] sm:$0xff]  ;;  %v38_v55 = vld [vmem:[%s1075_s0 + $0x38] sm:$0xff]  ;;  %v39_v56 = vld [vmem:[%s1075_s0 + $0x40] sm:$0xff] }
  0x21   :  { %v40_v57 = vld [vmem:[%s1075_s0 + $0x48] sm:$0xff]  ;;  %v41_v58 = vld [vmem:[%s1075_s0 + $0x50] sm:$0xff]  ;;  %v42_v59 = vld [vmem:[%s1075_s0 + $0x58] sm:$0xff] }
  0x22   :  { %v43_v60 = vld [vmem:[%s1075_s0 + $0x60] sm:$0xff]  ;;  %v44_v61 = vld [vmem:[%s1075_s0 + $0x68] sm:$0xff]  ;;  %v45_v62 = vld [vmem:[%s1075_s0 + $0x70] sm:$0xff] }
  0x23   :  { %757 = vmatpush3.bf16.msra.mxu0 %v754_v12  ;;  %785 = vmatpush3.bf16.msra.mxu1 %v782_v26  ;;  %v46_v63 = vld [vmem:[%s1075_s0 + $0x78] sm:$0xff]  ;;  %s863_s0 = smov [#allocation5]  }
  0x24   :  { %759 = vmatprep.subr.bf16.mxu0 %v758_v21  ;;  %787 = vmatprep.subr.bf16.mxu1 %v786_v32  ;;  %s471_s11 = sshll.u32 %s863_s0, 4  ;;  %s472_s11 = int_to_ptr.vmem [resolvable:$true] %s471_s11 }
  0x25   :  { %s834_s12 = scalar_lea.vmem %s472_s11, 1024  ;;  %p839_p9 = scmp.lt.s32.totalorder %s472_s11, %s472_s11 }
  0x26   :  { %p835_p8 = scmp.ne.s32.totalorder %s472_s11, %s834_s12  ;;  %p840_p10 = scmp.lt.s32.totalorder %s834_s12, %s834_s12 }
  0x27   :  { %761 = vmatpush3.bf16.msra.mxu0 %v758_v21  ;;  %789 = vmatpush3.bf16.msra.mxu1 %v786_v32 }
  0x28   :  { %763 = vmatprep.subr.bf16.mxu0 %v762_v27  ;;  %791 = vmatprep.subr.bf16.mxu1 %v790_v38  ;;  %p841_p11 = por %p840_p10, %p839_p9 }
  0x2a   :  { %p842_p12 = pnand %p841_p11, %p835_p8 }
  0x2b   :  { %765 = vmatpush3.bf16.msra.mxu0 %v762_v27  ;;  %793 = vmatpush3.bf16.msra.mxu1 %v790_v38 }
  0x2c   :  { %767 = vmatprep.subr.bf16.mxu0 %v766_v33  ;;  %795 = vmatprep.subr.bf16.mxu1 %v794_v42 }
  0x2f   :  { %769 = vmatpush3.bf16.msra.mxu0 %v766_v33  ;;  %797 = vmatpush3.bf16.msra.mxu1 %v794_v42 }
  0x30   :  { %771 = vmatprep.subr.bf16.mxu0 %v770_v39  ;;  %799 = vmatprep.subr.bf16.mxu1 %v798_v46 }
  0x33   :  { %773 = vmatpush3.bf16.msra.mxu0 %v770_v39  ;;  %801 = vmatpush3.bf16.msra.mxu1 %v798_v46 }
  0x34   :  { %803 = vmatprep.subr.bf16.mxu1 %v802_v51 }
  0x36   :  { %663 = vmatmul.mubr.f32.vlgmr.msra.gmra.mrb[0].mxu0 %v32_v45 }
  0x37   :  { %665 = vmatprep.mubr.f32.mxu0 %v33_v47  ;;  %805 = vmatpush3.bf16.msra.mxu1 %v802_v51 }
  0x3a   :  { %666 = vmatmul.mubr.f32.gmra.mrb[2].mxu0 %v34_v50 }
  0x3b   :  { %668 = vmatprep.mubr.f32.mxu0 %v35_v52 }
  0x3e   :  { %669 = vmatmul.mubr.f32.gmra.mrb[4].mxu0 %v36_v53 }
  0x3f   :  { %671 = vmatprep.mubr.f32.mxu0 %v37_v54 }
  0x42   :  { %672 = vmatmul.mubr.f32.gmra.mrb[6].mxu0 %v38_v55 }
  0x43   :  { %674 = vmatprep.mubr.f32.mxu0 %v39_v56 }
  0x46   :  { %675 = vmatmul.mubr.f32.gmra.mrb[8].mxu0 %v40_v57 }
  0x47   :  { %677 = vmatprep.mubr.f32.mxu0 %v41_v58 }
  0x4a   :  { %678 = vmatmul.mubr.f32.gmra.mrb[10].mxu0 %v42_v59 }
  0x4b   :  { %680 = vmatprep.mubr.f32.mxu0 %v43_v60 }
  0x4e   :  { %681 = vmatmul.mubr.f32.gmra.mrb[12].mxu0 %v44_v61 }
  0x4f   :  { %683 = vmatprep.mubr.f32.mxu0 %v45_v62 }
  0x52   :  { %684 = vmatmul.mubr.f32.gmra.mrb[14].mxu0 %v46_v63 }
 0x109   :  { %v664_v0 = vpop.f32.mrb[0].mxu0 }
 0x10a   :  { %v129_v1 = vpop.f32.mrb[1].mxu0 }
 0x10b   :  { %v522_v2 = vpack.c.bf16 %v664_v0, %v129_v1  ;;  %718 = vmatprep.mubr.f32.mxu1 %v129_v1 }
 0x10c   :  { %719 = vmatmul.mubr.f32.vlgmr.msra.gmra.mrb[0].mxu1 %v664_v0 }
 0x10d   :  { %523 = vst [vmem:[#allocation5] sm:$0xff] %v522_v2   ;;  %v667_v3 = vpop.f32.mrb[2].mxu0 }
 0x10e   :  { %v139_v4 = vpop.f32.mrb[3].mxu0 }
 0x10f   :  { %v527_v5 = vpack.c.bf16 %v667_v3, %v139_v4  ;;  %721 = vmatprep.mubr.f32.mxu1 %v139_v4 }
 0x110   :  { %722 = vmatmul.mubr.f32.gmra.mrb[2].mxu1 %v667_v3 }
 0x111   :  { %559 = vst [vmem:[#allocation5 + $0x8] sm:$0xff] %v527_v5   ;;  %v670_v6 = vpop.f32.mrb[4].mxu0 }
 0x112   :  { %v149_v7 = vpop.f32.mrb[5].mxu0 }
 0x113   :  { %v532_v8 = vpack.c.bf16 %v670_v6, %v149_v7  ;;  %724 = vmatprep.mubr.f32.mxu1 %v149_v7 }
 0x114   :  { %725 = vmatmul.mubr.f32.gmra.mrb[4].mxu1 %v670_v6 }
 0x115   :  { %560 = vst [vmem:[#allocation5 + $0x10] sm:$0xff] %v532_v8   ;;  %v673_v9 = vpop.f32.mrb[6].mxu0 }
 0x116   :  { %v159_v10 = vpop.f32.mrb[7].mxu0 }
 0x117   :  { %v537_v11 = vpack.c.bf16 %v673_v9, %v159_v10  ;;  %727 = vmatprep.mubr.f32.mxu1 %v159_v10 }
 0x118   :  { %728 = vmatmul.mubr.f32.gmra.mrb[6].mxu1 %v673_v9 }
 0x119   :  { %561 = vst [vmem:[#allocation5 + $0x18] sm:$0xff] %v537_v11   ;;  %v676_v12 = vpop.f32.mrb[8].mxu0 }
 0x11a   :  { %v169_v13 = vpop.f32.mrb[9].mxu0 }
 0x11b   :  { %v542_v14 = vpack.c.bf16 %v676_v12, %v169_v13  ;;  %730 = vmatprep.mubr.f32.mxu1 %v169_v13 }
 0x11c   :  { %731 = vmatmul.mubr.f32.gmra.mrb[8].mxu1 %v676_v12 }
 0x11d   :  { %562 = vst [vmem:[#allocation5 + $0x20] sm:$0xff] %v542_v14   ;;  %v679_v15 = vpop.f32.mrb[10].mxu0 }
 0x11e   :  { %v179_v16 = vpop.f32.mrb[11].mxu0 }
 0x11f   :  { %v547_v17 = vpack.c.bf16 %v679_v15, %v179_v16  ;;  %733 = vmatprep.mubr.f32.mxu1 %v179_v16 }
 0x120   :  { %734 = vmatmul.mubr.f32.gmra.mrb[10].mxu1 %v679_v15 }
 0x121   :  { %563 = vst [vmem:[#allocation5 + $0x28] sm:$0xff] %v547_v17   ;;  %v682_v18 = vpop.f32.mrb[12].mxu0 }
 0x122   :  { %v189_v19 = vpop.f32.mrb[13].mxu0 }
 0x123   :  { %v552_v20 = vpack.c.bf16 %v682_v18, %v189_v19  ;;  %736 = vmatprep.mubr.f32.mxu1 %v189_v19 }
 0x124   :  { %737 = vmatmul.mubr.f32.gmra.mrb[12].mxu1 %v682_v18 }
 0x125   :  { %564 = vst [vmem:[#allocation5 + $0x30] sm:$0xff] %v552_v20   ;;  %v685_v21 = vpop.f32.mrb[14].mxu0 }
 0x126   :  { %v199_v22 = vpop.f32.mrb[15].mxu0 }
 0x127   :  { %v557_v23 = vpack.c.bf16 %v685_v21, %v199_v22  ;;  %739 = vmatprep.mubr.f32.mxu1 %v199_v22 }
 0x128   :  { %740 = vmatmul.mubr.f32.gmra.mrb[14].mxu1 %v685_v21 }
 0x129   :  { %565 = vst [vmem:[#allocation5 + $0x38] sm:$0xff] %v557_v23  }
 0x12a   :  { %845 = shalt.err (!%p842_p12)
}
 0x12b   :  { %s846_s15 = scalar_lea.hbm %s1078_s3, 1024 }
 0x12c   :  { %p847_p13 = scmp.ne.s32.totalorder %s1078_s3, %s846_s15  ;;  %p850_p0 = scmp.lt.u32.totalorder %s846_s15, %s1078_s3 }
 0x12e   :  { %p852_p1 = pnand %p850_p0, %p847_p13 }
 0x130   :  { %855 = shalt.err (!%p852_p1)
}
 0x131   :  { %s864_s19 = smov 64   ;;  %s865_s20 = smov 4   ;;  %vm449_vm0 = vcmask 15360  }
 0x132   :  { %477 = dma.vmem_to_hbm [thread:$0]  %s472_s11, 1024, %s1078_s3, [#allocation4], %s864_s19, %s864_s19, %s865_s20  }
 0x1df   :  { %v720_v24 = vpop.f32.mrb[0].mxu1 }
 0x1e0   :  { %451 = vst.msk [vmem:[%s1079_s4 + $0x8] sm:$0xff] %vm449_vm0, %v720_v24  ;;  %v370_v25 = vpop.f32.mrb[1].mxu1 }
 0x1e1   :  { %450 = vst.msk [vmem:[%s1079_s4] sm:$0xff] %vm449_vm0, %v370_v25 }
 0x1e3   :  { %v723_v26 = vpop.f32.mrb[2].mxu1 }
 0x1e4   :  { %453 = vst.msk [vmem:[%s1079_s4 + $0x18] sm:$0xff] %vm449_vm0, %v723_v26  ;;  %v380_v27 = vpop.f32.mrb[3].mxu1 }
 0x1e5   :  { %452 = vst.msk [vmem:[%s1079_s4 + $0x10] sm:$0xff] %vm449_vm0, %v380_v27 }
 0x1e7   :  { %v726_v28 = vpop.f32.mrb[4].mxu1 }
 0x1e8   :  { %455 = vst.msk [vmem:[%s1079_s4 + $0x28] sm:$0xff] %vm449_vm0, %v726_v28  ;;  %v390_v29 = vpop.f32.mrb[5].mxu1 }
 0x1e9   :  { %454 = vst.msk [vmem:[%s1079_s4 + $0x20] sm:$0xff] %vm449_vm0, %v390_v29 }
 0x1eb   :  { %v729_v30 = vpop.f32.mrb[6].mxu1 }
 0x1ec   :  { %457 = vst.msk [vmem:[%s1079_s4 + $0x38] sm:$0xff] %vm449_vm0, %v729_v30  ;;  %v400_v31 = vpop.f32.mrb[7].mxu1 }
 0x1ed   :  { %456 = vst.msk [vmem:[%s1079_s4 + $0x30] sm:$0xff] %vm449_vm0, %v400_v31 }
 0x1ef   :  { %v732_v32 = vpop.f32.mrb[8].mxu1 }
 0x1f0   :  { %459 = vst.msk [vmem:[%s1079_s4 + $0x48] sm:$0xff] %vm449_vm0, %v732_v32  ;;  %v410_v33 = vpop.f32.mrb[9].mxu1 }
 0x1f1   :  { %458 = vst.msk [vmem:[%s1079_s4 + $0x40] sm:$0xff] %vm449_vm0, %v410_v33 }
 0x1f3   :  { %v735_v34 = vpop.f32.mrb[10].mxu1 }
 0x1f4   :  { %461 = vst.msk [vmem:[%s1079_s4 + $0x58] sm:$0xff] %vm449_vm0, %v735_v34  ;;  %v420_v35 = vpop.f32.mrb[11].mxu1 }
 0x1f5   :  { %460 = vst.msk [vmem:[%s1079_s4 + $0x50] sm:$0xff] %vm449_vm0, %v420_v35 }
 0x1f7   :  { %v738_v36 = vpop.f32.mrb[12].mxu1 }
 0x1f8   :  { %463 = vst.msk [vmem:[%s1079_s4 + $0x68] sm:$0xff] %vm449_vm0, %v738_v36  ;;  %v430_v37 = vpop.f32.mrb[13].mxu1 }
 0x1f9   :  { %462 = vst.msk [vmem:[%s1079_s4 + $0x60] sm:$0xff] %vm449_vm0, %v430_v37 }
 0x1fb   :  { %v741_v38 = vpop.f32.mrb[14].mxu1 }
 0x1fc   :  { %465 = vst.msk [vmem:[%s1079_s4 + $0x78] sm:$0xff] %vm449_vm0, %v741_v38  ;;  %v440_v39 = vpop.f32.mrb[15].mxu1 }
 0x1fd   :  { %464 = vst.msk [vmem:[%s1079_s4 + $0x70] sm:$0xff] %vm449_vm0, %v440_v39 }
 0x1fe   :  { %858 = dma.done.wait [#allocation4], 1024  }
 0x1ff   :  { %859 = vsyncadd [#allocation4], 4294966272 }
 0x200   :  { %485 = vsyncpa [#allocation3], 1 }
 0x201   :  { %486 = vsyncpa [#allocation4], 1 }

</bundles_post_ra>
